<compile_context>
chip_gen: v6e
topology: v6e:2x2x1
jax: 0.10.0
libtpu: 0.0.40
codegen_flags: <defaults>
</compile_context>

<pallas_src>
import jax
import jax.numpy as jnp
import numpy as np
from jax.experimental import pallas as pl
from jax.experimental.pallas import tpu as pltpu


def dp_kernel(x_ref, top_ref, bot_ref, wdw_ref, wpw_ref, o_ref):
    # x_ref:   (1, TH, W, C)  row-strip of the input (NHWC, C on lanes)
    # top_ref: (1, 1, W, C)   row just above the strip (zeros at image border)
    # bot_ref: (1, 1, W, C)   row just below the strip (zeros at image border)
    # wdw_ref: (9, C)         depthwise 3x3 taps, flattened dy*3+dx
    # wpw_ref: (C, C)         pointwise weights, (C_in, C_out)
    # o_ref:   (1, TH, W, C)
    _, TH, W, C = x_ref.shape

    x = x_ref[0].astype(jnp.float32)         # (TH, W, C)
    top = top_ref[0].astype(jnp.float32)     # (1, W, C)
    bot = bot_ref[0].astype(jnp.float32)     # (1, W, C)

    # Halo-extended strip along H (outer dim -> row shifts below are cheap slices).
    xv = jnp.concatenate([top, x, bot], axis=0)           # (TH + 2, W, C)

    # W-axis neighbours via XLU roll + zero-mask of the wrapped (padding) column.
    colv = jax.lax.broadcasted_iota(jnp.int32, (TH + 2, W, C), 1)
    xv_wm1 = jnp.where(colv == 0, 0.0, pltpu.roll(xv, 1, 1))          # value at w-1
    xv_wp1 = jnp.where(colv == W - 1, 0.0, pltpu.roll(xv, W - 1, 1))  # value at w+1
    taps_by_dx = (xv_wm1, xv, xv_wp1)

    # Depthwise 3x3: 9 shifted element-wise FMAs with per-channel weights (VPU).
    acc = jnp.zeros((TH, W, C), jnp.float32)
    for dy in range(3):
        for dx in range(3):
            t = taps_by_dx[dx][dy:dy + TH]                # (TH, W, C)
            w = wdw_ref[dy * 3 + dx].astype(jnp.float32)  # (C,) broadcast on lanes
            acc = acc + t * w
    y1 = jnp.maximum(acc, 0.0)                            # (TH, W, C), f32

    # Pointwise 1x1 conv.
    if C < 128:
        # Tiny channel count: MXU would run at K=N=C (<3% utilized), so do C
        # broadcast-FMAs on the VPU; keeps (TH, W, C) layout -> store needs no
        # relayout.
        y2 = jnp.zeros((TH, W, C), jnp.float32)
        for ci in range(C):
            y2 = y2 + y1[:, :, ci:ci + 1] * wpw_ref[ci].astype(jnp.float32)
    else:
        # Real model widths: feed the MXU in bf16 (v6e/v7x fast path), f32 accum.
        y2 = jnp.dot(y1.reshape(TH * W, C).astype(jnp.bfloat16),
                     wpw_ref[...].astype(jnp.bfloat16),
                     preferred_element_type=jnp.float32).reshape(TH, W, C)

    o_ref[0] = jnp.maximum(y2, 0.0).astype(o_ref.dtype)


def _pick_row_tile(H, W, C, itemsize, budget_bytes=2 * 1024 * 1024):
    """Largest row-tile that divides H, leaves >=2 tiles, and fits the budget."""
    best = None
    for cand in (8, 16, 32, 64, 128, 256):
        if cand >= H or H % cand != 0:
            continue
        if best is None or cand * W * C * itemsize <= budget_bytes:
            best = cand
    return best if best is not None else H


def dp_layer_pallas(x_nchw, w_dw, w_pw):
    """x_nchw: (B, C, H, W); w_dw: (C, 1, 3, 3); w_pw: (C, C, 1, 1)."""
    B, C, H, W = x_nchw.shape
    dtype = x_nchw.dtype
    itemsize = jnp.dtype(dtype).itemsize

    # Interface-boundary layout change only (an NHWC-native model would skip it).
    x = jnp.transpose(x_nchw, (0, 2, 3, 1))                            # (B, H, W, C)
    wdw = jnp.transpose(w_dw[:, 0], (1, 2, 0)).reshape(9, C)           # (9, C)
    wpw = jnp.transpose(w_pw[:, :, 0, 0], (1, 0))                      # (C_in, C_out)

    TH = _pick_row_tile(H, W, C, itemsize)
    nT = H // TH

    # One halo row above / below each row-tile (zeros at the image borders).
    zero_row = jnp.zeros((B, 1, W, C), dtype)
    if nT > 1:
        top = jnp.concatenate([zero_row, x[:, TH - 1:H - 1:TH]], axis=1)  # (B, nT, W, C)
        bot = jnp.concatenate([x[:, TH:H:TH], zero_row], axis=1)          # (B, nT, W, C)
    else:
        top, bot = zero_row, zero_row

    blk_bytes = TH * W * C * itemsize
    vmem_limit = int(min(48 * 2**20, max(16 * 2**20, 16 * blk_bytes)))

    cost = pl.CostEstimate(
        flops=int(2 * B * H * W * C * (9 + C)),
        transcendentals=0,
        bytes_accessed=int(2 * B * H * W * C * itemsize + (9 * C + C * C) * itemsize),
    )

    out = pl.pallas_call(
        dp_kernel,
        out_shape=jax.ShapeDtypeStruct((B, H, W, C), dtype),
        grid_spec=pltpu.PrefetchScalarGridSpec(
            num_scalar_prefetch=0,
            grid=(B, nT),
            in_specs=[
                pl.BlockSpec((1, TH, W, C), lambda b, i: (b, i, 0, 0)),  # x strip
                pl.BlockSpec((1, 1, W, C), lambda b, i: (b, i, 0, 0)),   # top halo
                pl.BlockSpec((1, 1, W, C), lambda b, i: (b, i, 0, 0)),   # bottom halo
                pl.BlockSpec((9, C), lambda b, i: (0, 0)),               # depthwise w
                pl.BlockSpec((C, C), lambda b, i: (0, 0)),               # pointwise w
            ],
            out_specs=pl.BlockSpec((1, TH, W, C), lambda b, i: (b, i, 0, 0)),
        ),
        compiler_params=pltpu.CompilerParams(
            dimension_semantics=("parallel", "parallel"),
            vmem_limit_bytes=vmem_limit,
        ),
        cost_estimate=cost,
    )(x, top, bot, wdw, wpw)

    return jnp.transpose(out, (0, 3, 1, 2))   # back to NCHW


def dp_layer_ref(x, w_dw, w_pw):
    """Pure-JAX reference (NCHW, mirrors the PyTorch module)."""
    C = x.shape[1]
    y1 = jax.lax.conv_general_dilated(
        x, w_dw, window_strides=(1, 1), padding=((1, 1), (1, 1)),
        dimension_numbers=('NCHW', 'OIHW', 'NCHW'), feature_group_count=C)
    y1 = jnp.maximum(y1, 0.0)
    y2 = jax.lax.conv_general_dilated(
        y1, w_pw, window_strides=(1, 1), padding=((0, 0), (0, 0)),
        dimension_numbers=('NCHW', 'OIHW', 'NCHW'))
    return jnp.maximum(y2, 0.0)


if __name__ == "__main__":
    B, C, H, W = 2, 4, 16, 16
    key = jax.random.PRNGKey(0)
    kx, kdw, kpw = jax.random.split(key, 3)

    x = jax.random.normal(kx, (B, C, H, W), dtype=jnp.float32)
    # Deterministic synthetic weights matching nn.Conv2d shapes (no bias).
    w_dw = jax.random.normal(kdw, (C, 1, 3, 3), dtype=jnp.float32) * 0.3   # depthwise
    w_pw = jax.random.normal(kpw, (C, C, 1, 1), dtype=jnp.float32) * 0.3   # pointwise

    out = jax.block_until_ready(dp_layer_pallas(x, w_dw, w_pw))
    ref = jax.block_until_ready(dp_layer_ref(x, w_dw, w_pw))

    assert out.shape == (B, C, H, W)
    np.testing.assert_allclose(np.asarray(out), np.asarray(ref), rtol=1e-5, atol=1e-5)

    print("KERNEL_OK")
</pallas_src>

<mosaic_0001>
module attributes {stable_mosaic.version = 11 : i64} {
  func.func @dp_kernel(%arg0: i32, %arg1: i32, %arg2: memref<1x8x16x4xf32, #tpu.memory_space<vmem>>, %arg3: memref<1x1x16x4xf32, #tpu.memory_space<vmem>>, %arg4: memref<1x1x16x4xf32, #tpu.memory_space<vmem>>, %arg5: memref<9x4xf32, #tpu.memory_space<vmem>>, %arg6: memref<4x4xf32, #tpu.memory_space<vmem>>, %arg7: memref<1x8x16x4xf32, #tpu.memory_space<vmem>>) attributes {dimension_semantics = [#tpu.dimension_semantics<parallel>, #tpu.dimension_semantics<parallel>], iteration_bounds = array<i64: 2, 2>, scalar_prefetch = 0 : i64, scratch_operands = 0 : i64, tpu.core_type = #tpu.core_type<tc>, window_params = [{transform_indices = @transform_0, window_bounds = array<i64: 1, 8, 16, 4>}, {transform_indices = @transform_1, window_bounds = array<i64: 1, 1, 16, 4>}, {transform_indices = @transform_2, window_bounds = array<i64: 1, 1, 16, 4>}, {pipeline_mode = #tpu.pipeline_mode<synchronous>, transform_indices = @transform_3, window_bounds = array<i64: 9, 4>}, {pipeline_mode = #tpu.pipeline_mode<synchronous>, transform_indices = @transform_4, window_bounds = array<i64: 4, 4>}, {transform_indices = @transform_5, window_bounds = array<i64: 1, 8, 16, 4>}]} {
    %c0 = arith.constant 0 : index
    %c0_0 = arith.constant 0 : index
    %c0_1 = arith.constant 0 : index
    %c0_2 = arith.constant 0 : index
    %0 = vector.load %arg2[%c0, %c0_0, %c0_1, %c0_2] : memref<1x8x16x4xf32, #tpu.memory_space<vmem>>, vector<1x8x16x4xf32>
    %1 = vector.shape_cast %0 : vector<1x8x16x4xf32> to vector<8x16x4xf32>
    %c0_3 = arith.constant 0 : index
    %c0_4 = arith.constant 0 : index
    %c0_5 = arith.constant 0 : index
    %c0_6 = arith.constant 0 : index
    %2 = vector.load %arg3[%c0_3, %c0_4, %c0_5, %c0_6] : memref<1x1x16x4xf32, #tpu.memory_space<vmem>>, vector<1x1x16x4xf32>
    %3 = vector.shape_cast %2 : vector<1x1x16x4xf32> to vector<1x16x4xf32>
    %c0_7 = arith.constant 0 : index
    %c0_8 = arith.constant 0 : index
    %c0_9 = arith.constant 0 : index
    %c0_10 = arith.constant 0 : index
    %4 = vector.load %arg4[%c0_7, %c0_8, %c0_9, %c0_10] : memref<1x1x16x4xf32, #tpu.memory_space<vmem>>, vector<1x1x16x4xf32>
    %5 = vector.shape_cast %4 : vector<1x1x16x4xf32> to vector<1x16x4xf32>
    %6 = tpu.concatenate %3, %1, %5 in 0 : vector<1x16x4xf32>, vector<8x16x4xf32>, vector<1x16x4xf32> -> vector<10x16x4xf32>
    %7 = tpu.iota {dimensions = array<i32: 1>} : vector<10x16x4xi32>
    %c0_i32 = arith.constant 0 : i32
    %8 = vector.broadcast %c0_i32 : i32 to vector<10x16x4xi32>
    %9 = arith.cmpi eq, %7, %8 : vector<10x16x4xi32>
    %c1_i32 = arith.constant 1 : i32
    %10 = tpu.dynamic_rotate %6 by %c1_i32 dim 1 : vector<10x16x4xf32>, i32 -> vector<10x16x4xf32>
    %cst = arith.constant 0.000000e+00 : f32
    %11 = vector.broadcast %cst : f32 to vector<10x16x4xf32>
    %12 = arith.select %9, %11, %10 : vector<10x16x4xi1>, vector<10x16x4xf32>
    %c15_i32 = arith.constant 15 : i32
    %13 = vector.broadcast %c15_i32 : i32 to vector<10x16x4xi32>
    %14 = arith.cmpi eq, %7, %13 : vector<10x16x4xi32>
    %c15_i32_11 = arith.constant 15 : i32
    %15 = tpu.dynamic_rotate %6 by %c15_i32_11 dim 1 : vector<10x16x4xf32>, i32 -> vector<10x16x4xf32>
    %cst_12 = arith.constant 0.000000e+00 : f32
    %16 = vector.broadcast %cst_12 : f32 to vector<10x16x4xf32>
    %17 = arith.select %14, %16, %15 : vector<10x16x4xi1>, vector<10x16x4xf32>
    %cst_13 = arith.constant 0.000000e+00 : f32
    %18 = vector.broadcast %cst_13 : f32 to vector<8x16x4xf32>
    %19 = vector.extract_strided_slice %12 {offsets = [0, 0, 0], sizes = [8, 16, 4], strides = [1, 1, 1]} : vector<10x16x4xf32> to vector<8x16x4xf32>
    %c0_14 = arith.constant 0 : index
    %c0_15 = arith.constant 0 : index
    %20 = vector.load %arg5[%c0_14, %c0_15] : memref<9x4xf32, #tpu.memory_space<vmem>>, vector<1x4xf32>
    %21 = vector.shape_cast %20 : vector<1x4xf32> to vector<4xf32>
    %22 = vector.shape_cast %21 : vector<4xf32> to vector<1x1x4xf32>
    %23 = vector.broadcast %22 : vector<1x1x4xf32> to vector<8x16x4xf32>
    %24 = arith.mulf %19, %23 : vector<8x16x4xf32>
    %25 = arith.addf %18, %24 : vector<8x16x4xf32>
    %26 = vector.extract_strided_slice %6 {offsets = [0, 0, 0], sizes = [8, 16, 4], strides = [1, 1, 1]} : vector<10x16x4xf32> to vector<8x16x4xf32>
    %c1 = arith.constant 1 : index
    %c0_16 = arith.constant 0 : index
    %27 = vector.load %arg5[%c1, %c0_16] : memref<9x4xf32, #tpu.memory_space<vmem>>, vector<1x4xf32>
    %28 = vector.shape_cast %27 : vector<1x4xf32> to vector<4xf32>
    %29 = vector.shape_cast %28 : vector<4xf32> to vector<1x1x4xf32>
    %30 = vector.broadcast %29 : vector<1x1x4xf32> to vector<8x16x4xf32>
    %31 = arith.mulf %26, %30 : vector<8x16x4xf32>
    %32 = arith.addf %25, %31 : vector<8x16x4xf32>
    %33 = vector.extract_strided_slice %17 {offsets = [0, 0, 0], sizes = [8, 16, 4], strides = [1, 1, 1]} : vector<10x16x4xf32> to vector<8x16x4xf32>
    %c2 = arith.constant 2 : index
    %c0_17 = arith.constant 0 : index
    %34 = vector.load %arg5[%c2, %c0_17] : memref<9x4xf32, #tpu.memory_space<vmem>>, vector<1x4xf32>
    %35 = vector.shape_cast %34 : vector<1x4xf32> to vector<4xf32>
    %36 = vector.shape_cast %35 : vector<4xf32> to vector<1x1x4xf32>
    %37 = vector.broadcast %36 : vector<1x1x4xf32> to vector<8x16x4xf32>
    %38 = arith.mulf %33, %37 : vector<8x16x4xf32>
    %39 = arith.addf %32, %38 : vector<8x16x4xf32>
    %40 = vector.extract_strided_slice %12 {offsets = [1, 0, 0], sizes = [8, 16, 4], strides = [1, 1, 1]} : vector<10x16x4xf32> to vector<8x16x4xf32>
    %c3 = arith.constant 3 : index
    %c0_18 = arith.constant 0 : index
    %41 = vector.load %arg5[%c3, %c0_18] : memref<9x4xf32, #tpu.memory_space<vmem>>, vector<1x4xf32>
    %42 = vector.shape_cast %41 : vector<1x4xf32> to vector<4xf32>
    %43 = vector.shape_cast %42 : vector<4xf32> to vector<1x1x4xf32>
    %44 = vector.broadcast %43 : vector<1x1x4xf32> to vector<8x16x4xf32>
    %45 = arith.mulf %40, %44 : vector<8x16x4xf32>
    %46 = arith.addf %39, %45 : vector<8x16x4xf32>
    %47 = vector.extract_strided_slice %6 {offsets = [1, 0, 0], sizes = [8, 16, 4], strides = [1, 1, 1]} : vector<10x16x4xf32> to vector<8x16x4xf32>
    %c4 = arith.constant 4 : index
    %c0_19 = arith.constant 0 : index
    %48 = vector.load %arg5[%c4, %c0_19] : memref<9x4xf32, #tpu.memory_space<vmem>>, vector<1x4xf32>
    %49 = vector.shape_cast %48 : vector<1x4xf32> to vector<4xf32>
    %50 = vector.shape_cast %49 : vector<4xf32> to vector<1x1x4xf32>
    %51 = vector.broadcast %50 : vector<1x1x4xf32> to vector<8x16x4xf32>
    %52 = arith.mulf %47, %51 : vector<8x16x4xf32>
    %53 = arith.addf %46, %52 : vector<8x16x4xf32>
    %54 = vector.extract_strided_slice %17 {offsets = [1, 0, 0], sizes = [8, 16, 4], strides = [1, 1, 1]} : vector<10x16x4xf32> to vector<8x16x4xf32>
    %c5 = arith.constant 5 : index
    %c0_20 = arith.constant 0 : index
    %55 = vector.load %arg5[%c5, %c0_20] : memref<9x4xf32, #tpu.memory_space<vmem>>, vector<1x4xf32>
    %56 = vector.shape_cast %55 : vector<1x4xf32> to vector<4xf32>
    %57 = vector.shape_cast %56 : vector<4xf32> to vector<1x1x4xf32>
    %58 = vector.broadcast %57 : vector<1x1x4xf32> to vector<8x16x4xf32>
    %59 = arith.mulf %54, %58 : vector<8x16x4xf32>
    %60 = arith.addf %53, %59 : vector<8x16x4xf32>
    %61 = vector.extract_strided_slice %12 {offsets = [2, 0, 0], sizes = [8, 16, 4], strides = [1, 1, 1]} : vector<10x16x4xf32> to vector<8x16x4xf32>
    %c6 = arith.constant 6 : index
    %c0_21 = arith.constant 0 : index
    %62 = vector.load %arg5[%c6, %c0_21] : memref<9x4xf32, #tpu.memory_space<vmem>>, vector<1x4xf32>
    %63 = vector.shape_cast %62 : vector<1x4xf32> to vector<4xf32>
    %64 = vector.shape_cast %63 : vector<4xf32> to vector<1x1x4xf32>
    %65 = vector.broadcast %64 : vector<1x1x4xf32> to vector<8x16x4xf32>
    %66 = arith.mulf %61, %65 : vector<8x16x4xf32>
    %67 = arith.addf %60, %66 : vector<8x16x4xf32>
    %68 = vector.extract_strided_slice %6 {offsets = [2, 0, 0], sizes = [8, 16, 4], strides = [1, 1, 1]} : vector<10x16x4xf32> to vector<8x16x4xf32>
    %c7 = arith.constant 7 : index
    %c0_22 = arith.constant 0 : index
    %69 = vector.load %arg5[%c7, %c0_22] : memref<9x4xf32, #tpu.memory_space<vmem>>, vector<1x4xf32>
    %70 = vector.shape_cast %69 : vector<1x4xf32> to vector<4xf32>
    %71 = vector.shape_cast %70 : vector<4xf32> to vector<1x1x4xf32>
    %72 = vector.broadcast %71 : vector<1x1x4xf32> to vector<8x16x4xf32>
    %73 = arith.mulf %68, %72 : vector<8x16x4xf32>
    %74 = arith.addf %67, %73 : vector<8x16x4xf32>
    %75 = vector.extract_strided_slice %17 {offsets = [2, 0, 0], sizes = [8, 16, 4], strides = [1, 1, 1]} : vector<10x16x4xf32> to vector<8x16x4xf32>
    %c8 = arith.constant 8 : index
    %c0_23 = arith.constant 0 : index
    %76 = vector.load %arg5[%c8, %c0_23] : memref<9x4xf32, #tpu.memory_space<vmem>>, vector<1x4xf32>
    %77 = vector.shape_cast %76 : vector<1x4xf32> to vector<4xf32>
    %78 = vector.shape_cast %77 : vector<4xf32> to vector<1x1x4xf32>
    %79 = vector.broadcast %78 : vector<1x1x4xf32> to vector<8x16x4xf32>
    %80 = arith.mulf %75, %79 : vector<8x16x4xf32>
    %81 = arith.addf %74, %80 : vector<8x16x4xf32>
    %cst_24 = arith.constant 0.000000e+00 : f32
    %82 = vector.broadcast %cst_24 : f32 to vector<8x16x4xf32>
    %83 = arith.maximumf %81, %82 : vector<8x16x4xf32>
    %cst_25 = arith.constant 0.000000e+00 : f32
    %84 = vector.broadcast %cst_25 : f32 to vector<8x16x4xf32>
    %85 = vector.extract_strided_slice %83 {offsets = [0, 0, 0], sizes = [8, 16, 1], strides = [1, 1, 1]} : vector<8x16x4xf32> to vector<8x16x1xf32>
    %c0_26 = arith.constant 0 : index
    %c0_27 = arith.constant 0 : index
    %86 = vector.load %arg6[%c0_26, %c0_27] : memref<4x4xf32, #tpu.memory_space<vmem>>, vector<1x4xf32>
    %87 = vector.shape_cast %86 : vector<1x4xf32> to vector<4xf32>
    %88 = vector.shape_cast %87 : vector<4xf32> to vector<1x1x4xf32>
    %89 = vector.broadcast %85 : vector<8x16x1xf32> to vector<8x16x4xf32>
    %90 = vector.broadcast %88 : vector<1x1x4xf32> to vector<8x16x4xf32>
    %91 = arith.mulf %89, %90 : vector<8x16x4xf32>
    %92 = arith.addf %84, %91 : vector<8x16x4xf32>
    %93 = vector.extract_strided_slice %83 {offsets = [0, 0, 1], sizes = [8, 16, 1], strides = [1, 1, 1]} : vector<8x16x4xf32> to vector<8x16x1xf32>
    %c1_28 = arith.constant 1 : index
    %c0_29 = arith.constant 0 : index
    %94 = vector.load %arg6[%c1_28, %c0_29] : memref<4x4xf32, #tpu.memory_space<vmem>>, vector<1x4xf32>
    %95 = vector.shape_cast %94 : vector<1x4xf32> to vector<4xf32>
    %96 = vector.shape_cast %95 : vector<4xf32> to vector<1x1x4xf32>
    %97 = vector.broadcast %93 : vector<8x16x1xf32> to vector<8x16x4xf32>
    %98 = vector.broadcast %96 : vector<1x1x4xf32> to vector<8x16x4xf32>
    %99 = arith.mulf %97, %98 : vector<8x16x4xf32>
    %100 = arith.addf %92, %99 : vector<8x16x4xf32>
    %101 = vector.extract_strided_slice %83 {offsets = [0, 0, 2], sizes = [8, 16, 1], strides = [1, 1, 1]} : vector<8x16x4xf32> to vector<8x16x1xf32>
    %c2_30 = arith.constant 2 : index
    %c0_31 = arith.constant 0 : index
    %102 = vector.load %arg6[%c2_30, %c0_31] : memref<4x4xf32, #tpu.memory_space<vmem>>, vector<1x4xf32>
    %103 = vector.shape_cast %102 : vector<1x4xf32> to vector<4xf32>
    %104 = vector.shape_cast %103 : vector<4xf32> to vector<1x1x4xf32>
    %105 = vector.broadcast %101 : vector<8x16x1xf32> to vector<8x16x4xf32>
    %106 = vector.broadcast %104 : vector<1x1x4xf32> to vector<8x16x4xf32>
    %107 = arith.mulf %105, %106 : vector<8x16x4xf32>
    %108 = arith.addf %100, %107 : vector<8x16x4xf32>
    %109 = vector.extract_strided_slice %83 {offsets = [0, 0, 3], sizes = [8, 16, 1], strides = [1, 1, 1]} : vector<8x16x4xf32> to vector<8x16x1xf32>
    %c3_32 = arith.constant 3 : index
    %c0_33 = arith.constant 0 : index
    %110 = vector.load %arg6[%c3_32, %c0_33] : memref<4x4xf32, #tpu.memory_space<vmem>>, vector<1x4xf32>
    %111 = vector.shape_cast %110 : vector<1x4xf32> to vector<4xf32>
    %112 = vector.shape_cast %111 : vector<4xf32> to vector<1x1x4xf32>
    %113 = vector.broadcast %109 : vector<8x16x1xf32> to vector<8x16x4xf32>
    %114 = vector.broadcast %112 : vector<1x1x4xf32> to vector<8x16x4xf32>
    %115 = arith.mulf %113, %114 : vector<8x16x4xf32>
    %116 = arith.addf %108, %115 : vector<8x16x4xf32>
    %cst_34 = arith.constant 0.000000e+00 : f32
    %117 = vector.broadcast %cst_34 : f32 to vector<8x16x4xf32>
    %118 = arith.maximumf %116, %117 : vector<8x16x4xf32>
    %c0_35 = arith.constant 0 : index
    %c0_36 = arith.constant 0 : index
    %c0_37 = arith.constant 0 : index
    %c0_38 = arith.constant 0 : index
    %119 = vector.load %arg7[%c0_35, %c0_36, %c0_37, %c0_38] : memref<1x8x16x4xf32, #tpu.memory_space<vmem>>, vector<1x8x16x4xf32>
    %120 = vector.shape_cast %119 : vector<1x8x16x4xf32> to vector<8x16x4xf32>
    %121 = vector.shape_cast %118 : vector<8x16x4xf32> to vector<1x8x16x4xf32>
    tpu.vector_store %arg7[%c0_35, %c0_36, %c0_37, %c0_38], %121 {strides = array<i32>} : memref<1x8x16x4xf32, #tpu.memory_space<vmem>>, vector<1x8x16x4xf32>,
    return
  }
  func.func @transform_0(%arg0: i32, %arg1: i32) -> (i32, i32, i32, i32) {
    %c0_i32 = arith.constant 0 : i32
    %c0_i32_0 = arith.constant 0 : i32
    %c0_i32_1 = arith.constant 0 : i32
    return %arg0, %arg1, %c0_i32, %c0_i32_0 : i32, i32, i32, i32
  }
  func.func @transform_1(%arg0: i32, %arg1: i32) -> (i32, i32, i32, i32) {
    %c0_i32 = arith.constant 0 : i32
    %c0_i32_0 = arith.constant 0 : i32
    %c0_i32_1 = arith.constant 0 : i32
    return %arg0, %arg1, %c0_i32, %c0_i32_0 : i32, i32, i32, i32
  }
  func.func @transform_2(%arg0: i32, %arg1: i32) -> (i32, i32, i32, i32) {
    %c0_i32 = arith.constant 0 : i32
    %c0_i32_0 = arith.constant 0 : i32
    %c0_i32_1 = arith.constant 0 : i32
    return %arg0, %arg1, %c0_i32, %c0_i32_0 : i32, i32, i32, i32
  }
  func.func @transform_3(%arg0: i32, %arg1: i32) -> (i32, i32) {
    %c0_i32 = arith.constant 0 : i32
    %c0_i32_0 = arith.constant 0 : i32
    %c0_i32_1 = arith.constant 0 : i32
    return %c0_i32, %c0_i32_0 : i32, i32
  }
  func.func @transform_4(%arg0: i32, %arg1: i32) -> (i32, i32) {
    %c0_i32 = arith.constant 0 : i32
    %c0_i32_0 = arith.constant 0 : i32
    %c0_i32_1 = arith.constant 0 : i32
    return %c0_i32, %c0_i32_0 : i32, i32
  }
  func.func @transform_5(%arg0: i32, %arg1: i32) -> (i32, i32, i32, i32) {
    %c0_i32 = arith.constant 0 : i32
    %c0_i32_0 = arith.constant 0 : i32
    %c0_i32_1 = arith.constant 0 : i32
    return %arg0, %arg1, %c0_i32, %c0_i32_0 : i32, i32, i32, i32
  }
}

</mosaic_0001>

<bundles_post_ra>
// kernel: tpu_custom_call.1
= control target key start
LH: loop header
LB: loop body
LE: loop exit
PB: predicated region body
PF: predicated region fallthrough
CT: control target
= control target key end

     0   :  { %s1589_s18 = smov 0   ;;  %s1591_s19 = smov 0   ;;  %s2500_s0 = inlined_call_operand.vmem [shape: f32[2,16,16,4], index: 0, kind: input, shape index: {}]   ;;  %s2501_s1 = inlined_call_operand.vmem [shape: f32[2,2,16,4], index: 1, kind: input, shape index: {}]   ;;  %s2502_s2 = inlined_call_operand.vmem [shape: f32[2,2,16,4], index: 2, kind: input, shape index: {}]   ;;  %s2503_s3 = inlined_call_operand.vmem [shape: f32[9,4], index: 3, kind: input, shape index: {}]   ;;  %s2504_s4 = inlined_call_operand.vmem [shape: f32[4,4], index: 4, kind: input, shape index: {}]   ;;  %s2505_s5 = inlined_call_operand.vmem [shape: f32[2,16,16,4], index: 5, kind: output, shape index: {}]  }
   0x1   :  { %s1593_s20 = smov 0   ;;  %s1595_s21 = smov 0  }
   0x2   :  { %s1597_s22 = smov 0  }
   0x3 LB: > { %s24_s23 = sadd.s32 1, %s1545_s20  ;;  %s27_s24 = sadd.s32 1, %s1549_s21  ;;  %s1553_s22 = sphi %s1597_s22, %s15_s22   ;;  %s1549_s21 = sphi %s1595_s21, %s2509_s21   ;;  %s1545_s20 = sphi %s1593_s20, %s2508_s20   ;;  %s1541_s19 = sphi %s1591_s19, %s2507_s19   ;;  %s1537_s18 = sphi %s1589_s18, %s2506_s18  }
   0x4   : > { %p25_p0 = scmp.ge.s32.totalorder %s24_s23, 2  ;;  %p1433_p1 = scmp.ge.s32.totalorder %s1553_s22, 1 }
   0x5   : > { %p241_p2 = scmp.lt.s32.totalorder %s1553_s22, 5 }
   0x6   : > { %s2511_s23 = smov (%p25_p0, %s24_s23), 0  ;;  %s2513_s24 = smov (!%p25_p0, %s27_s24), %s1549_s21 }
   0x7   : > { %p242_p3 = pnand %p1433_p1, %p241_p2  ;;  %p29_p4 = scmp.ge.s32.totalorder %s2513_s24, 2 }
   0x8   : > { %s1434_s25 = sshll.u32 (!%p242_p3), %s1537_s18, 3  ;;  %p298_p5 = scmp.lt.s32.totalorder (!%p242_p3), %s1541_s19, 1 }
   0x9   : > { %s2515_s24 = smov (%p29_p4, %s2513_s24), 0  ;;  %245 = sbr.rel (%p242_p3) target bundleno = 363 (0x16b), region = 40 }
   0xa   : > { %p300_p6 = scmp.lt.s32.totalorder (!%p242_p3), %s1434_s25, 15  ;;  %p310_p7 = scmp.lt.s32.totalorder (!%p242_p3), %s1537_s18, 1 }
   0xe   : > { %v357_v0 = vlaneseq  ;;  %v1555_v1 = vmov 0   ;;  %s2517_s19 = smov (!%p298_p5, %s1541_s19), 1  ;;  %s2519_s25 = smov (!%p300_p6, %s1434_s25), 15  ;;  %v1671_v16 = vld [vmem:[%s2503_s3 + $0x4] ss:$0 sm:$0xff]  ;;  %vm1271_vm4 = vcmask 31744  }
   0xf   : > { %1507 = vset.pattern.permute.xlu0 %v1555_v1  ;;  %1508 = vset.pattern.permute.xlu1 %v1555_v1  ;;  %s1436_s26 = sshll.u32 %s2517_s19, 5  ;;  %s1435_s27 = sshll.u32 %s2519_s25, 1  ;;  %v1676_v17 = vld [vmem:[%s2503_s3 + $0x7] ss:$0 sm:$0xff]  ;;  %v1700_v21 = vld [vmem:[%s2503_s3] ss:$0 sm:$0xff] }
  0x10   : > { %v1624_v2 = vshrl.u32 %v357_v0, 7  ;;  %s1631_s28 = sadd.s32 %s1436_s26, %s1435_s27  ;;  %s1439_s8 = sshll.u32 %s2517_s19, 2  ;;  %v1705_v22 = vld [vmem:[%s2503_s3 + $0x1] ss:$0 sm:$0xff]  ;;  %v1725_v26 = vld [vmem:[%s2503_s3 + $0x2] ss:$0 sm:$0xff] }
  0x11   : > { %s1437_s29 = sshll.u32 %s1631_s28, 3  ;;  %s2521_s18 = smov (!%p310_p7, %s1537_s18), 1  ;;  %v1730_v27 = vld [vmem:[%s2503_s3 + $0x3] ss:$0 sm:$0xff]  ;;  %v1763_v46 = vld [vmem:[%s2503_s3 + $0x5] ss:$0 sm:$0xff] }
  0x12   : > { %v1629_v3 = vadd.s32 8, %v1624_v2  ;;  %s1639_s7 = scalar_lea.vmem %s2500_s0, %s1437_s29  ;;  %vm382_vm0 = vcmp.lt.s32.totalorder %v1624_v2, 1  ;;  %vm445_vm2 = vcmp.lt.s32.totalorder %v1624_v2, 7  ;;  %s1438_s9 = sshll.u32 %s2521_s18, 1  ;;  %vm360_vm3 = vcmp.eq.s32.totalorder %v1624_v2, 0 }
  0x13   : > { %v1645_v4 = vld [vmem:[%s1639_s7] sm:$0xff]  ;;  %v1648_v5 = vld [vmem:[%s1639_s7 + $0x8] sm:$0xff]  ;;  %v1651_v6 = vld [vmem:[%s1639_s7 + $0x10] sm:$0xff]  ;;  %s1666_s10 = sadd.s32 %s1439_s8, %s1438_s9  ;;  %s2385_s12 = scalar_lea.vmem %s2505_s5, %s1437_s29 }
  0x14   : > { %vm424_vm1 = vcmp.eq.s32.totalorder %v1629_v3, 15  ;;  %v1656_v7 = vld [vmem:[%s1639_s7 + $0x18] sm:$0xff]  ;;  %v363_v8 = vrot.slane %v1645_v4, 7  ;;  %v364_v9 = vrot.slane %v1651_v6, 7  ;;  %v373_v10 = vrot.slane %v1648_v5, 7  ;;  %s1440_s15 = sshll.u32 %s1666_s10, 3 }
  0x15   : > { %v426_v11 = vrot.slane %v1645_v4, 1  ;;  %v374_v12 = vrot.slane %v1656_v7, 7  ;;  %v427_v13 = vrot.slane %v1651_v6, 1  ;;  %v436_v14 = vrot.slane %v1648_v5, 1  ;;  %s316_s27 = scalar_lea.vmem %s2501_s1, %s1440_s15  ;;  %v1744_v34 = vld [vmem:[%s1639_s7 + $0x20] sm:$0xff]  ;;  %v1750_v39 = vld [vmem:[%s1639_s7 + $0x28] sm:$0xff]  ;;  %s325_s19 = scalar_lea.vmem %s2502_s2, %s1440_s15 }
  0x16   : > { %v437_v15 = vrot.slane %v1656_v7, 1  ;;  %v384_v23 = vsel %vm382_vm0, %v363_v8, %v373_v10  ;;  %v1732_v28 = vld [vmem:[%s316_s27] sm:$0xff]  ;;  %v354_v29 = vld [vmem:[%s316_s27 + $0x8] sm:$0xff]  ;;  %v533_v31 = vmul.f32 %v1705_v22, %v1656_v7  ;;  %v640_v32 = vmul.f32 %v1671_v16, %v1648_v5 }
  0x17   : > { %v385_v18 = vsel %vm382_vm0, %v364_v9, %v374_v12  ;;  %v457_v19 = vsel %vm445_vm2, %v436_v14, %v426_v11  ;;  %v1741_v33 = vmul.f32 %v1676_v17, %v1656_v7  ;;  %v362_v35 = vrot.slane %v1732_v28, 7  ;;  %v1773_v52 = vld [vmem:[%s2503_s3 + $0x6] ss:$0 sm:$0xff]  ;;  %v1780_v55 = vld [vmem:[%s2503_s3 + $0x8] ss:$0 sm:$0xff] }
  0x18   : > { %v458_v20 = vsel %vm445_vm2, %v437_v15, %v427_v13  ;;  %v469_v24 = vsel %vm424_vm1, 0.0, %v457_v19  ;;  %v496_v30 = vmul.f32 %v1700_v21, %v385_v18  ;;  %v372_v36 = vrot.slane %v354_v29, 7 }
  0x19   : > { %v471_v25 = vsel %vm424_vm1, 0.0, %v458_v20  ;;  %v425_v37 = vrot.slane %v1732_v28, 1  ;;  %v435_v38 = vrot.slane %v354_v29, 1  ;;  %v529_v40 = vmul.f32 %v1705_v22, %v354_v29 }
  0x1a   : > { %v568_v41 = vmul.f32 %v1725_v26, %v469_v24  ;;  %v570_v42 = vmul.f32 %v1725_v26, %v471_v25  ;;  %v603_v43 = vmul.f32 %v1730_v27, %v384_v23  ;;  %v383_v44 = vsel %vm382_vm0, %v362_v35, %v372_v36 }
  0x1b   : > { %v456_v45 = vsel %vm445_vm2, %v435_v38, %v425_v37  ;;  %v494_v47 = vmul.f32 %v1700_v21, %v384_v23  ;;  %v365_v48 = vrot.slane %v1744_v34, 7  ;;  %v492_v50 = vmul.f32 %v1700_v21, %v383_v44 }
  0x1c   : > { %v467_v49 = vsel %vm424_vm1, 0.0, %v456_v45  ;;  %v549_v51 = vadd.f32 %v533_v31, %v496_v30  ;;  %v375_v53 = vrot.slane %v1750_v39, 7  ;;  %v428_v56 = vrot.slane %v1744_v34, 1 }
  0x1d   : > { %v566_v54 = vmul.f32 %v1725_v26, %v467_v49  ;;  %v438_v57 = vrot.slane %v1750_v39, 1  ;;  %v531_v58 = vmul.f32 %v1705_v22, %v1648_v5  ;;  %v545_v59 = vadd.f32 %v529_v40, %v492_v50 }
  0x1e   : > { %v605_v60 = vmul.f32 %v1730_v27, %v385_v18  ;;  %v677_v61 = vmul.f32 %v1763_v46, %v469_v24  ;;  %v386_v62 = vsel %vm382_vm0, %v365_v48, %v375_v53  ;;  %v679_v63 = vmul.f32 %v1763_v46, %v471_v25 }
  0x1f   : > { %v714_v0 = vmul.f32 %v1773_v52, %v385_v18  ;;  %v459_v1 = vsel %vm445_vm2, %v438_v57, %v428_v56  ;;  %v547_v19 = vadd.f32 %v531_v58, %v494_v47  ;;  %v582_v20 = vadd.f32 %v566_v54, %v545_v59 }
  0x20   : > { %v788_v23 = vmul.f32 %v1780_v55, %v471_v25  ;;  %v498_v24 = vmul.f32 %v1700_v21, %v386_v62  ;;  %v535_v29 = vmul.f32 %v1705_v22, %v1750_v39  ;;  %v586_v30 = vadd.f32 %v570_v42, %v549_v51 }
  0x21   : > { %v584_v31 = vadd.f32 %v568_v41, %v547_v19  ;;  %v607_v18 = vmul.f32 %v1730_v27, %v386_v62  ;;  %v642_v40 = vmul.f32 %v1671_v16, %v1656_v7  ;;  %v619_v44 = vadd.f32 %v603_v43, %v582_v20  ;;  %v1869_v20 = vld [vmem:[%s1639_s7 + $0x30] sm:$0xff] }
  0x22   : > { %v473_v45 = vsel %vm424_vm1, 0.0, %v459_v1  ;;  %v393_v47 = vsel %vm382_vm0, %v372_v36, %v362_v35  ;;  %v394_v25 = vsel %vm382_vm0, %v373_v10, %v363_v8  ;;  %v716_v42 = vmul.f32 %v1773_v52, %v386_v62 }
  0x23   : > { %v621_v41 = vadd.f32 %v605_v60, %v584_v31  ;;  %v395_v43 = vsel %vm382_vm0, %v374_v12, %v364_v9  ;;  %v403_v35 = vsel %vm360_vm3, 0.0, %v393_v47  ;;  %v656_v36 = vadd.f32 %v640_v32, %v619_v44 }
  0x24   : > { %v551_v49 = vadd.f32 %v535_v29, %v498_v24  ;;  %v1830_v50 = vsel %vm360_vm3, 0.0, %v395_v43  ;;  %v446_v8 = vsel %vm445_vm2, %v425_v37, %v435_v38  ;;  %v572_v10 = vmul.f32 %v1725_v26, %v473_v45 }
  0x25   : > { %v658_v51 = vadd.f32 %v642_v40, %v621_v41  ;;  %v405_v54 = vsel %vm360_vm3, 0.0, %v394_v25  ;;  %v491_v9 = vmul.f32 %v1700_v21, %v403_v35  ;;  %v693_v12 = vadd.f32 %v677_v61, %v656_v36 }
  0x26   : > { %v753_v32 = vmul.f32 %v1676_v17, %v1750_v39  ;;  %v1846_v37 = vsel %vm445_vm2, %v426_v11, %v436_v14  ;;  %v528_v38 = vmul.f32 %v1705_v22, %v1732_v28  ;;  %v495_v59 = vmul.f32 %v1700_v21, %v1830_v50 }
  0x27   : > { %v695_v58 = vadd.f32 %v679_v63, %v658_v51  ;;  %v532_v60 = vmul.f32 %v1705_v22, %v1651_v6  ;;  %v565_v61 = vmul.f32 %v1725_v26, %v446_v8  ;;  %v730_v5 = vadd.f32 %v714_v0, %v693_v12 }
  0x28   : > { %v1861_v11 = vsel %vm445_vm2, %v427_v13, %v437_v15  ;;  %v544_v14 = vadd.f32 %v528_v38, %v491_v9  ;;  %v602_v28 = vmul.f32 %v1730_v27, %v405_v54  ;;  %v1864_v62 = vadd.f32 %v572_v10, %v551_v49  ;;  %v1878_v15 = vld [vmem:[%s1639_s7 + $0x38] sm:$0xff] }
  0x29   : > { %v681_v63 = vmul.f32 %v1763_v46, %v473_v45  ;;  %v732_v1 = vadd.f32 %v716_v42, %v695_v58  ;;  %v790_v19 = vmul.f32 %v1780_v55, %v473_v45  ;;  %v767_v7 = vadd.f32 %v1741_v33, %v730_v5 }
  0x2a   : > { %v1873_v0 = vmul.f32 %v1700_v21, %v405_v54  ;;  %v581_v24 = vadd.f32 %v565_v61, %v544_v14  ;;  %v639_v13 = vmul.f32 %v1671_v16, %v1645_v4  ;;  %v548_v31 = vadd.f32 %v532_v60, %v495_v59 }
  0x2b   : > { %v769_v29 = vadd.f32 %v753_v32, %v732_v1  ;;  %v569_v40 = vmul.f32 %v1725_v26, %v1861_v11  ;;  %v676_v44 = vmul.f32 %v1763_v46, %v1846_v37  ;;  %v804_v45 = vadd.f32 %v788_v23, %v767_v7 }
  0x2c   : > { %v618_v47 = vadd.f32 %v602_v28, %v581_v24  ;;  %v713_v33 = vmul.f32 %v1773_v52, %v1830_v50  ;;  %v366_v25 = vrot.slane %v1869_v20, 7  ;;  %v376_v42 = vrot.slane %v1878_v15, 7 }
  0x2d   : > { %v806_v41 = vadd.f32 %v790_v19, %v769_v29  ;;  %v429_v43 = vrot.slane %v1869_v20, 1  ;;  %v439_v35 = vrot.slane %v1878_v15, 1  ;;  %v1890_v36 = vmax.f32 %v804_v45, 0.0 }
  0x2e   : > { %v655_v49 = vadd.f32 %v639_v13, %v618_v47  ;;  %v537_v8 = vmul.f32 %v1705_v22, %v1878_v15  ;;  %v623_v23 = vadd.f32 %v607_v18, %v586_v30  ;;  %v387_v51 = vsel %vm382_vm0, %v366_v25, %v376_v42 }
  0x2f   : > { %v1894_v10 = vmax.f32 %v806_v41, 0.0  ;;  %v460_v54 = vsel %vm445_vm2, %v439_v35, %v429_v43  ;;  %v644_v9 = vmul.f32 %v1671_v16, %v1750_v39  ;;  %843 = vperm.xlu0 %1507, %v1890_v36   ;;  %v750_v32 = vmul.f32 %v1676_v17, %v1651_v6 }
  0x30   : > { %v692_v12 = vadd.f32 %v676_v44, %v655_v49  ;;  %v475_v30 = vsel %vm424_vm1, 0.0, %v460_v54  ;;  %v500_v18 = vmul.f32 %v1700_v21, %v387_v51  ;;  %v585_v38 = vadd.f32 %v569_v40, %v548_v31 }
  0x31   : > { %853 = vperm.xlu1 %1508, %v1894_v10   ;;  %v787_v58 = vmul.f32 %v1780_v55, %v1861_v11  ;;  %v660_v59 = vadd.f32 %v644_v9, %v623_v23  ;;  %v718_v60 = vmul.f32 %v1773_v52, %v387_v51  ;;  %v574_v14 = vmul.f32 %v1725_v26, %v475_v30 }
  0x32   : > { %v729_v61 = vadd.f32 %v713_v33, %v692_v12  ;;  %v553_v5 = vadd.f32 %v537_v8, %v500_v18  ;;  %v755_v28 = vmul.f32 %v1676_v17, %v1878_v15  ;;  %v792_v19 = vmul.f32 %v1780_v55, %v475_v30 }
  0x33   : > { %v697_v1 = vadd.f32 %v681_v63, %v660_v59  ;;  %v396_v7 = vsel %vm382_vm0, %v375_v53, %v365_v48  ;;  %v397_v24 = vsel %vm382_vm0, %v376_v42, %v366_v25  ;;  %v1936_v48 = vsel %vm445_vm2, %v428_v56, %v438_v57  ;;  %v1954_v42 = vld [vmem:[%s1639_s7 + $0x40] sm:$0xff] }
  0x34   : > { %v766_v13 = vadd.f32 %v750_v32, %v729_v61  ;;  %v1926_v29 = vsel %vm360_vm3, 0.0, %v396_v7  ;;  %v411_v63 = vsel %vm360_vm3, 0.0, %v397_v24  ;;  %v450_v31 = vsel %vm445_vm2, %v429_v43, %v439_v35  ;;  %v1957_v43 = vld [vmem:[%s1639_s7 + $0x48] sm:$0xff] }
  0x35   : > { %v734_v53 = vadd.f32 %v718_v60, %v697_v1  ;;  %v499_v40 = vmul.f32 %v1700_v21, %v411_v63  ;;  %v536_v44 = vmul.f32 %v1705_v22, %v1869_v20  ;;  %v609_v47 = vmul.f32 %v1730_v27, %v387_v51 }
  0x36   : > { %v803_v45 = vadd.f32 %v787_v58, %v766_v13  ;;  %v683_v39 = vmul.f32 %v1763_v46, %v475_v30  ;;  %v606_v33 = vmul.f32 %v1730_v27, %v1926_v29  ;;  %v1947_v25 = vadd.f32 %v574_v14, %v553_v5 }
  0x37   : > { %v771_v56 = vadd.f32 %v755_v28, %v734_v53  ;;  %v571_v57 = vmul.f32 %v1725_v26, %v1936_v48  ;;  %v643_v41 = vmul.f32 %v1671_v16, %v1744_v34  ;;  %v573_v49 = vmul.f32 %v1725_v26, %v450_v31 }
  0x38   : > { %v1959_v35 = vmax.f32 %v803_v45, 0.0  ;;  %v622_v8 = vadd.f32 %v606_v33, %v585_v38  ;;  %v680_v23 = vmul.f32 %v1763_v46, %v1936_v48  ;;  %v552_v54 = vadd.f32 %v536_v44, %v499_v40 }
  0x39   : > { %v808_v51 = vadd.f32 %v792_v19, %v771_v56  ;;  %v608_v9 = vmul.f32 %v1730_v27, %v411_v63  ;;  %v717_v12 = vmul.f32 %v1773_v52, %v411_v63  ;;  %v754_v30 = vmul.f32 %v1676_v17, %v1869_v20 }
  0x3a   : > { %838 = vperm.xlu0 %1507, %v1959_v35   ;;  %v659_v32 = vadd.f32 %v643_v41, %v622_v8  ;;  %v367_v18 = vrot.slane %v1954_v42, 7  ;;  %v377_v58 = vrot.slane %v1957_v43, 7  ;;  %v430_v59 = vrot.slane %v1954_v42, 1 }
  0x3b   : > { %v1971_v38 = vmax.f32 %v808_v51, 0.0  ;;  %v440_v60 = vrot.slane %v1957_v43, 1  ;;  %v539_v61 = vmul.f32 %v1705_v22, %v1957_v43  ;;  %v625_v28 = vadd.f32 %v609_v47, %v1864_v62 }
  0x3c   : > { %v696_v5 = vadd.f32 %v680_v23, %v659_v32  ;;  %v388_v14 = vsel %vm382_vm0, %v367_v18, %v377_v58  ;;  %v646_v1 = vmul.f32 %v1671_v16, %v1878_v15  ;;  %v682_v19 = vmul.f32 %v1763_v46, %v450_v31 }
  0x3d   : > { %863 = vperm.xlu1 %1508, %v1971_v38   ;;  %v791_v7 = vmul.f32 %v1780_v55, %v450_v31  ;;  %v461_v24 = vsel %vm445_vm2, %v440_v60, %v430_v59  ;;  %v502_v13 = vmul.f32 %v1700_v21, %v388_v14  ;;  %v720_v62 = vmul.f32 %v1773_v52, %v388_v14 }
  0x3e   : > { %v733_v63 = vadd.f32 %v717_v12, %v696_v5  ;;  %v477_v53 = vsel %vm424_vm1, 0.0, %v461_v24  ;;  %v662_v40 = vadd.f32 %v646_v1, %v625_v28  ;;  %v1991_v44 = vadd.f32 %v573_v49, %v552_v54 }
  0x3f   : > { %v555_v15 = vadd.f32 %v539_v61, %v502_v13  ;;  %v576_v45 = vmul.f32 %v1725_v26, %v477_v53  ;;  %v757_v31 = vmul.f32 %v1676_v17, %v1957_v43  ;;  %v794_v56 = vmul.f32 %v1780_v55, %v477_v53  ;;  %v2018_v61 = vld [vmem:[%s1639_s7 + $0x58] sm:$0xff] }
  0x40   : > { %v770_v47 = vadd.f32 %v754_v30, %v733_v63  ;;  %v699_v33 = vadd.f32 %v683_v39, %v662_v40  ;;  %v398_v41 = vsel %vm382_vm0, %v377_v58, %v367_v18  ;;  %v451_v49 = vsel %vm445_vm2, %v430_v59, %v440_v60  ;;  %v2015_v60 = vld [vmem:[%s1639_s7 + $0x50] sm:$0xff] }
  0x41   : > { %v413_v8 = vsel %vm360_vm3, 0.0, %v398_v41  ;;  %v497_v23 = vmul.f32 %v1700_v21, %v1926_v29  ;;  %v534_v51 = vmul.f32 %v1705_v22, %v1744_v34  ;;  %v538_v32 = vmul.f32 %v1705_v22, %v1954_v42 }
  0x42   : > { %v807_v54 = vadd.f32 %v791_v7, %v770_v47  ;;  %v736_v39 = vadd.f32 %v720_v62, %v699_v33  ;;  %v501_v12 = vmul.f32 %v1700_v21, %v413_v8  ;;  %v2010_v30 = vadd.f32 %v576_v45, %v555_v15 }
  0x43   : > { %v611_v18 = vmul.f32 %v1730_v27, %v388_v14  ;;  %v685_v58 = vmul.f32 %v1763_v46, %v477_v53  ;;  %v550_v59 = vadd.f32 %v534_v51, %v497_v23  ;;  %v575_v1 = vmul.f32 %v1725_v26, %v451_v49 }
  0x44   : > { %v2020_v5 = vmax.f32 %v807_v54, 0.0  ;;  %v773_v28 = vadd.f32 %v757_v31, %v736_v39  ;;  %v610_v7 = vmul.f32 %v1730_v27, %v413_v8  ;;  %v554_v24 = vadd.f32 %v538_v32, %v501_v12 }
  0x45   : > { %v587_v13 = vadd.f32 %v571_v57, %v550_v59  ;;  %v645_v63 = vmul.f32 %v1671_v16, %v1869_v20  ;;  %v684_v14 = vmul.f32 %v1763_v46, %v451_v49  ;;  %v719_v40 = vmul.f32 %v1773_v52, %v413_v8 }
  0x46   : > { %858 = vperm.xlu0 %1507, %v2020_v5   ;;  %v810_v53 = vadd.f32 %v794_v56, %v773_v28  ;;  %v368_v62 = vrot.slane %v2015_v60, 7  ;;  %v378_v15 = vrot.slane %v2018_v61, 7  ;;  %v431_v31 = vrot.slane %v2015_v60, 1 }
  0x47   : > { %v624_v45 = vadd.f32 %v608_v9, %v587_v13  ;;  %v441_v47 = vrot.slane %v2018_v61, 1  ;;  %v541_v57 = vmul.f32 %v1705_v22, %v2018_v61  ;;  %v627_v56 = vadd.f32 %v611_v18, %v1947_v25 }
  0x48   : > { %v2035_v20 = vmax.f32 %v810_v53, 0.0  ;;  %v389_v33 = vsel %vm382_vm0, %v368_v62, %v378_v15  ;;  %v648_v41 = vmul.f32 %v1671_v16, %v1957_v43  ;;  %v756_v9 = vmul.f32 %v1676_v17, %v1954_v42 }
  0x49   : > { %v661_v8 = vadd.f32 %v645_v63, %v624_v45  ;;  %v462_v23 = vsel %vm445_vm2, %v441_v47, %v431_v31  ;;  %v504_v51 = vmul.f32 %v1700_v21, %v389_v33  ;;  %v793_v54 = vmul.f32 %v1780_v55, %v451_v49 }
  0x4a   : > { %873 = vperm.xlu1 %1508, %v2035_v20   ;;  %v479_v39 = vsel %vm424_vm1, 0.0, %v462_v23  ;;  %v664_v25 = vadd.f32 %v648_v41, %v627_v56  ;;  %v722_v12 = vmul.f32 %v1773_v52, %v389_v33  ;;  %v2052_v43 = vadd.f32 %v575_v1, %v554_v24  ;;  %v2070_v56 = vld [vmem:[%s1639_s7 + $0x60] sm:$0xff] }
  0x4b   : > { %v698_v32 = vadd.f32 %v682_v19, %v661_v8  ;;  %v557_v18 = vadd.f32 %v541_v57, %v504_v51  ;;  %v578_v59 = vmul.f32 %v1725_v26, %v479_v39  ;;  %v613_v28 = vmul.f32 %v1730_v27, %v389_v33 }
  0x4c   : > { %v701_v13 = vadd.f32 %v685_v58, %v664_v25  ;;  %v759_v49 = vmul.f32 %v1676_v17, %v2018_v61  ;;  %v399_v63 = vsel %vm382_vm0, %v378_v15, %v368_v62  ;;  %v452_v19 = vsel %vm445_vm2, %v431_v31, %v441_v47  ;;  %v2078_v47 = vld [vmem:[%s1639_s7 + $0x68] sm:$0xff] }
  0x4d   : > { %v735_v53 = vadd.f32 %v719_v40, %v698_v32  ;;  %v415_v1 = vsel %vm360_vm3, 0.0, %v399_v63  ;;  %v540_v24 = vmul.f32 %v1705_v22, %v2015_v60  ;;  %v687_v45 = vmul.f32 %v1763_v46, %v479_v39 }
  0x4e   : > { %v738_v58 = vadd.f32 %v722_v12, %v701_v13  ;;  %v796_v57 = vmul.f32 %v1780_v55, %v479_v39  ;;  %v503_v33 = vmul.f32 %v1700_v21, %v415_v1  ;;  %v2072_v40 = vadd.f32 %v578_v59, %v557_v18 }
  0x4f   : > { %v772_v62 = vadd.f32 %v756_v9, %v735_v53  ;;  %v626_v15 = vadd.f32 %v610_v7, %v1991_v44  ;;  %v647_v31 = vmul.f32 %v1671_v16, %v1954_v42  ;;  %v577_v23 = vmul.f32 %v1725_v26, %v452_v19 }
  0x50   : > { %v775_v41 = vadd.f32 %v759_v49, %v738_v58  ;;  %v556_v8 = vadd.f32 %v540_v24, %v503_v33  ;;  %v612_v51 = vmul.f32 %v1730_v27, %v415_v1  ;;  %v721_v12 = vmul.f32 %v1773_v52, %v415_v1 }
  0x51   : > { %v809_v39 = vadd.f32 %v793_v54, %v772_v62  ;;  %v663_v25 = vadd.f32 %v647_v31, %v626_v15  ;;  %v369_v9 = vrot.slane %v2070_v56, 7  ;;  %v758_v44 = vmul.f32 %v1676_v17, %v2015_v60 }
  0x52   : > { %v812_v32 = vadd.f32 %v796_v57, %v775_v41  ;;  %v379_v42 = vrot.slane %v2078_v47, 7  ;;  %v432_v7 = vrot.slane %v2070_v56, 1  ;;  %v442_v13 = vrot.slane %v2078_v47, 1 }
  0x53   : > { %v2088_v18 = vmax.f32 %v809_v39, 0.0  ;;  %v700_v59 = vadd.f32 %v684_v14, %v663_v25  ;;  %v543_v54 = vmul.f32 %v1705_v22, %v2078_v47  ;;  %v629_v53 = vadd.f32 %v613_v28, %v2010_v30 }
  0x54   : > { %v2093_v49 = vmax.f32 %v812_v32, 0.0  ;;  %v390_v63 = vsel %vm382_vm0, %v369_v9, %v379_v42  ;;  %v650_v1 = vmul.f32 %v1671_v16, %v2018_v61  ;;  %v795_v14 = vmul.f32 %v1780_v55, %v452_v19 }
  0x55   : > { %868 = vperm.xlu0 %1507, %v2088_v18   ;;  %v737_v24 = vadd.f32 %v721_v12, %v700_v59  ;;  %v463_v58 = vsel %vm445_vm2, %v442_v13, %v432_v7  ;;  %v506_v57 = vmul.f32 %v1700_v21, %v390_v63  ;;  %v686_v33 = vmul.f32 %v1763_v46, %v452_v19 }
  0x56   : > { %883 = vperm.xlu1 %1508, %v2093_v49   ;;  %v481_v30 = vsel %vm424_vm1, 0.0, %v463_v58  ;;  %v666_v28 = vadd.f32 %v650_v1, %v629_v53  ;;  %v724_v61 = vmul.f32 %v1773_v52, %v390_v63  ;;  %v593_v62 = vadd.f32 %v577_v23, %v556_v8  ;;  %v2126_v53 = vld [vmem:[%s1639_s7 + $0x70] sm:$0xff] }
  0x57   : > { %v774_v15 = vadd.f32 %v758_v44, %v737_v24  ;;  %v559_v31 = vadd.f32 %v543_v54, %v506_v57  ;;  %v580_v41 = vmul.f32 %v1725_v26, %v481_v30  ;;  %v615_v39 = vmul.f32 %v1730_v27, %v390_v63 }
  0x58   : > { %v703_v25 = vadd.f32 %v687_v45, %v666_v28  ;;  %v761_v12 = vmul.f32 %v1676_v17, %v2078_v47  ;;  %v400_v19 = vsel %vm382_vm0, %v379_v42, %v369_v9  ;;  %v453_v8 = vsel %vm445_vm2, %v432_v7, %v442_v13  ;;  %v352_v9 = vld [vmem:[%s1639_s7 + $0x78] sm:$0xff] }
  0x59   : > { %v811_v32 = vadd.f32 %v795_v14, %v774_v15  ;;  %v417_v59 = vsel %vm360_vm3, 0.0, %v400_v19  ;;  %v542_v23 = vmul.f32 %v1705_v22, %v2070_v56  ;;  %v689_v44 = vmul.f32 %v1763_v46, %v481_v30 }
  0x5a   : > { %v740_v54 = vadd.f32 %v724_v61, %v703_v25  ;;  %v798_v45 = vmul.f32 %v1780_v55, %v481_v30  ;;  %v505_v63 = vmul.f32 %v1700_v21, %v417_v59  ;;  %v596_v1 = vadd.f32 %v580_v41, %v559_v31 }
  0x5b   : > { %v2129_v42 = vmax.f32 %v811_v32, 0.0  ;;  %v628_v24 = vadd.f32 %v612_v51, %v2052_v43  ;;  %v649_v7 = vmul.f32 %v1671_v16, %v2015_v60  ;;  %v579_v58 = vmul.f32 %v1725_v26, %v453_v8 }
  0x5c   : > { %v777_v13 = vadd.f32 %v761_v12, %v740_v54  ;;  %v558_v14 = vadd.f32 %v542_v23, %v505_v63  ;;  %v614_v57 = vmul.f32 %v1730_v27, %v417_v59  ;;  %v723_v30 = vmul.f32 %v1773_v52, %v417_v59 }
  0x5d   : > { %878 = vperm.xlu0 %1507, %v2129_v42   ;;  %v665_v21 = vadd.f32 %v649_v7, %v628_v24  ;;  %v370_v28 = vrot.slane %v2126_v53, 7  ;;  %v380_v61 = vrot.slane %v352_v9, 7  ;;  %v760_v43 = vmul.f32 %v1676_v17, %v2070_v56 }
  0x5e   : > { %v814_v15 = vadd.f32 %v798_v45, %v777_v13  ;;  %v433_v60 = vrot.slane %v2126_v53, 1  ;;  %v443_v51 = vrot.slane %v352_v9, 1  ;;  %v631_v25 = vadd.f32 %v615_v39, %v2072_v40 }
  0x5f   : > { %v702_v31 = vadd.f32 %v686_v33, %v665_v21  ;;  %v391_v41 = vsel %vm382_vm0, %v370_v28, %v380_v61  ;;  %v652_v12 = vmul.f32 %v1671_v16, %v2078_v47  ;;  %v688_v32 = vmul.f32 %v1763_v46, %v453_v8 }
  0x60   : > { %v2147_v19 = vmax.f32 %v814_v15, 0.0  ;;  %v797_v59 = vmul.f32 %v1780_v55, %v453_v8  ;;  %v464_v23 = vsel %vm445_vm2, %v443_v51, %v433_v60  ;;  %v726_v47 = vmul.f32 %v1773_v52, %v391_v41  ;;  %v356_v15 = vld [vmem:[%s325_s19 + $0x8] sm:$0xff] }
  0x61   : > { %v739_v33 = vadd.f32 %v723_v30, %v702_v31  ;;  %v483_v40 = vsel %vm424_vm1, 0.0, %v464_v23  ;;  %v668_v39 = vadd.f32 %v652_v12, %v631_v25  ;;  %v595_v54 = vadd.f32 %v579_v58, %v558_v14  ;;  %v355_v30 = vld [vmem:[%s325_s19] sm:$0xff] }
  0x62   : > { %893 = vperm.xlu1 %1508, %v2147_v19   ;;  %v617_v8 = vmul.f32 %v1730_v27, %v391_v41  ;;  %v763_v45 = vmul.f32 %v1676_v17, %v352_v9  ;;  %v401_v63 = vsel %vm382_vm0, %v380_v61, %v370_v28  ;;  %v630_v21 = vadd.f32 %v614_v57, %v593_v62 }
  0x63   : > { %v776_v24 = vadd.f32 %v760_v43, %v739_v33  ;;  %v705_v7 = vadd.f32 %v689_v44, %v668_v39  ;;  %v419_v13 = vsel %vm360_vm3, 0.0, %v401_v63  ;;  %v691_v31 = vmul.f32 %v1763_v46, %v483_v40 }
  0x64   : > { %v800_v25 = vmul.f32 %v1780_v55, %v483_v40  ;;  %v454_v14 = vsel %vm445_vm2, %v433_v60, %v443_v51  ;;  %v651_v58 = vmul.f32 %v1671_v16, %v2070_v56  ;;  %v616_v44 = vmul.f32 %v1730_v27, %v419_v13 }
  0x65   : > { %v813_v41 = vadd.f32 %v797_v59, %v776_v24  ;;  %v742_v28 = vadd.f32 %v726_v47, %v705_v7  ;;  %v725_v61 = vmul.f32 %v1773_v52, %v419_v13  ;;  %v371_v62 = vrot.slane %v355_v30, 7 }
  0x66   : > { %v667_v43 = vadd.f32 %v651_v58, %v630_v21  ;;  %v381_v57 = vrot.slane %v356_v15, 7  ;;  %v434_v12 = vrot.slane %v355_v30, 1  ;;  %v444_v40 = vrot.slane %v356_v15, 1 }
  0x67   : > { %v2176_v23 = vmax.f32 %v813_v41, 0.0  ;;  %v779_v33 = vadd.f32 %v763_v45, %v742_v28  ;;  %v633_v39 = vadd.f32 %v617_v8, %v596_v1  ;;  %v762_v60 = vmul.f32 %v1676_v17, %v2126_v53 }
  0x68   : > { %v704_v63 = vadd.f32 %v688_v32, %v667_v43  ;;  %v392_v56 = vsel %vm382_vm0, %v371_v62, %v381_v57  ;;  %v654_v51 = vmul.f32 %v1671_v16, %v352_v9  ;;  %v799_v47 = vmul.f32 %v1780_v55, %v454_v14 }
  0x69   : > { %888 = vperm.xlu0 %1507, %v2176_v23   ;;  %v816_v59 = vadd.f32 %v800_v25, %v779_v33  ;;  %v465_v24 = vsel %vm445_vm2, %v444_v40, %v434_v12  ;;  %v402_v1 = vsel %vm382_vm0, %v381_v57, %v371_v62  ;;  %v728_v7 = vmul.f32 %v1773_v52, %v392_v56 }
  0x6a   : > { %v741_v32 = vadd.f32 %v725_v61, %v704_v63  ;;  %v485_v8 = vsel %vm424_vm1, 0.0, %v465_v24  ;;  %v670_v45 = vadd.f32 %v654_v51, %v633_v39  ;;  %v690_v9 = vmul.f32 %v1763_v46, %v454_v14 }
  0x6b   : > { %v2192_v13 = vmax.f32 %v816_v59, 0.0  ;;  %v421_v21 = vsel %vm360_vm3, 0.0, %v402_v1  ;;  %v632_v25 = vadd.f32 %v616_v44, %v595_v54  ;;  %v765_v28 = vmul.f32 %v1676_v17, %v356_v15 }
  0x6c   : > { %v778_v58 = vadd.f32 %v762_v60, %v741_v32  ;;  %v707_v41 = vadd.f32 %v691_v31, %v670_v45  ;;  %v653_v61 = vmul.f32 %v1671_v16, %v2126_v53  ;;  %v567_v3 = vmul.f32 %v1725_v26, %v1846_v37 }
  0x6d   : > { %903 = vperm.xlu1 %1508, %v2192_v13   ;;  %v802_v43 = vmul.f32 %v1780_v55, %v485_v8  ;;  %v530_v14 = vmul.f32 %v1705_v22, %v1645_v4  ;;  %v727_v31 = vmul.f32 %v1773_v52, %v421_v21  ;;  %v604_v15 = vmul.f32 %v1730_v27, %v1830_v50 }
  0x6e   : > { %v815_v62 = vadd.f32 %v799_v47, %v778_v58  ;;  %v744_v57 = vadd.f32 %v728_v7, %v707_v41  ;;  %v669_v54 = vadd.f32 %v653_v61, %v632_v25  ;;  %v455_v53 = vsel %vm445_vm2, %v434_v12, %v444_v40 }
  0x6f   : > { %v546_v26 = vadd.f32 %v530_v14, %v1873_v0  ;;  %v764_v39 = vmul.f32 %v1676_v17, %v355_v30  ;;  %v641_v22 = vmul.f32 %v1671_v16, %v1651_v6  ;;  %v801_v27 = vmul.f32 %v1780_v55, %v455_v53 }
  0x70   : > { %v2212_v37 = vmax.f32 %v815_v62, 0.0  ;;  %v781_v44 = vadd.f32 %v765_v28, %v744_v57  ;;  %v706_v33 = vadd.f32 %v690_v9, %v669_v54  ;;  %v678_v2 = vmul.f32 %v1763_v46, %v1861_v11 }
  0x71   : > { %v583_v4 = vadd.f32 %v567_v3, %v546_v26  ;;  %v715_v30 = vmul.f32 %v1773_v52, %v1926_v29  ;;  %v752_v56 = vmul.f32 %v1676_v17, %v1744_v34  ;;  %v789_v46 = vmul.f32 %v1780_v55, %v1936_v48 }
  0x72   : > { %898 = vperm.xlu0 %1507, %v2212_v37   ;;  %v818_v63 = vadd.f32 %v802_v43, %v781_v44  ;;  %v743_v60 = vadd.f32 %v727_v31, %v706_v33  ;;  %v1556_v24 = vmov 1   ;;  %v1557_v17 = vmov 2  }
  0x73   : > { %v620_v50 = vadd.f32 %v604_v15, %v583_v4  ;;  %v1558_v34 = vmov 3  }
  0x74   : > { %v2221_v0 = vmax.f32 %v818_v63, 0.0  ;;  %v780_v12 = vadd.f32 %v764_v39, %v743_v60 }
  0x75   : > { %v657_v40 = vadd.f32 %v641_v22, %v620_v50 }
  0x76   : > { %913 = vperm.xlu1 %1508, %v2221_v0   ;;  %v817_v6 = vadd.f32 %v801_v27, %v780_v12 }
  0x77   : > { %v694_v16 = vadd.f32 %v678_v2, %v657_v40 }
  0x78   : > { %v2228_v51 = vmax.f32 %v817_v6, 0.0 }
  0x79   : > { %v731_v59 = vadd.f32 %v715_v30, %v694_v16 }
  0x7a   : > { %908 = vperm.xlu0 %1507, %v2228_v51  }
  0x7b   : > { %v768_v11 = vadd.f32 %v752_v56, %v731_v59 }
  0x7d   : > { %v805_v47 = vadd.f32 %v789_v46, %v768_v11 }
  0x7e   : > { %1509 = vset.pattern.permute.xlu0 %v1556_v24 }
  0x7f   : > { %v821_v52 = vmax.f32 %v805_v47, 0.0  ;;  %954 = vperm.xlu0 %1509, %v1959_v35  }
  0x81   : > { %848 = vperm.xlu1 %1508, %v821_v52  }
  0x83   : > { %966 = vperm.xlu0 %1509, %v1894_v10  }
  0x85   : > { %1510 = vset.pattern.permute.xlu1 %v1556_v24 }
  0x86   : > { %958 = vperm.xlu1 %1510, %v1890_v36  }
  0x87   : > { %974 = vperm.xlu0 %1509, %v1971_v38  }
  0x8a   : > { %962 = vperm.xlu1 %1510, %v821_v52  }
  0x8b   : > { %982 = vperm.xlu0 %1509, %v2035_v20  }
  0x8e   : > { %970 = vperm.xlu1 %1510, %v2020_v5  }
  0x8f   : > { %990 = vperm.xlu0 %1509, %v2093_v49  }
  0x92   : > { %978 = vperm.xlu1 %1510, %v2088_v18  }
  0x93   : > { %998 = vperm.xlu0 %1509, %v2147_v19  }
  0x96   : > { %986 = vperm.xlu1 %1510, %v2129_v42  }
  0x97   : > { %1006 = vperm.xlu0 %1509, %v2192_v13  }
  0x9a   : > { %994 = vperm.xlu1 %1510, %v2176_v23  }
  0x9b   : > { %1014 = vperm.xlu0 %1509, %v2221_v0  }
  0x9e   : > { %1002 = vperm.xlu1 %1510, %v2212_v37  }
  0x9f   : > { %1512 = vset.pattern.permute.xlu0 %v1557_v17 }
  0xa0   : > { %1059 = vperm.xlu0 %1512, %v1890_v36  }
  0xa2   : > { %1010 = vperm.xlu1 %1510, %v2228_v51  }
  0xa4   : > { %1071 = vperm.xlu0 %1512, %v2020_v5  }
  0xa6   : > { %1511 = vset.pattern.permute.xlu1 %v1557_v17 }
  0xa7   : > { %1055 = vperm.xlu1 %1511, %v1959_v35  }
  0xa8   : > { %1079 = vperm.xlu0 %1512, %v2088_v18  }
  0xaa   : > { %v844_v55 = vpop.permute.xlu0 %843 }
  0xab   : > { %1063 = vperm.xlu1 %1511, %v821_v52  }
  0xac   : > { %1087 = vperm.xlu0 %1512, %v2129_v42  }
  0xaf   : > { %1067 = vperm.xlu1 %1511, %v1894_v10  }
  0xb0   : > { %1095 = vperm.xlu0 %1512, %v2176_v23  }
  0xb3   : > { %1075 = vperm.xlu1 %1511, %v1971_v38  }
  0xb4   : > { %1103 = vperm.xlu0 %1512, %v2212_v37  }
  0xb5   : > { %v2270_v29 = vpop.permute.xlu0 %838 }
  0xb7   : > { %1083 = vperm.xlu1 %1511, %v2035_v20  }
  0xb8   : > { %1111 = vperm.xlu0 %1512, %v2228_v51  }
  0xbb   : > { %1091 = vperm.xlu1 %1511, %v2093_v49  }
  0xbc   : > { %1513 = vset.pattern.permute.xlu0 %v1558_v34 }
  0xbd   : > { %1156 = vperm.xlu0 %1513, %v1959_v35  }
  0xbf   : > { %1099 = vperm.xlu1 %1511, %v2147_v19  }
  0xc1   : > { %1168 = vperm.xlu0 %1513, %v1894_v10   ;;  %v2272_v10 = vpop.permute.xlu1 %853  ;;  %v859_v48 = vpop.permute.xlu0 %858 }
  0xc3   : > { %1107 = vperm.xlu1 %1511, %v2192_v13  }
  0xc5   : > { %1176 = vperm.xlu0 %1513, %v1971_v38   ;;  %v2277_v35 = vpop.permute.xlu1 %863 }
  0xc7   : > { %1115 = vperm.xlu1 %1511, %v2221_v0  }
  0xc9   : > { %1184 = vperm.xlu0 %1513, %v2035_v20   ;;  %v2281_v38 = vpop.permute.xlu1 %873 }
  0xcb   : > { %1514 = vset.pattern.permute.xlu1 %v1558_v34 }
  0xcc   : > { %1160 = vperm.xlu1 %1514, %v1890_v36  }
  0xcd   : > { %1192 = vperm.xlu0 %1513, %v2093_v49  }
  0xd0   : > { %1164 = vperm.xlu1 %1514, %v821_v52   ;;  %v869_v36 = vpop.permute.xlu0 %868 }
  0xd1   : > { %1200 = vperm.xlu0 %1513, %v2147_v19  }
  0xd4   : > { %1172 = vperm.xlu1 %1514, %v2020_v5   ;;  %v2285_v5 = vpop.permute.xlu1 %883 }
  0xd5   : > { %1208 = vperm.xlu0 %1513, %v2192_v13   ;;  %v2302_v13 = vld [vmem:[%s2504_s4] ss:$0 sm:$0xff] }
  0xd6   : > { %v921_v21 = vmul.f32 %v2302_v13, %v844_v55  ;;  %v924_v57 = vmul.f32 %v2302_v13, %v859_v48  ;;  %v926_v26 = vmul.f32 %v2302_v13, %v869_v36 }
  0xd8   : > { %1180 = vperm.xlu1 %1514, %v2088_v18   ;;  %v879_v20 = vpop.permute.xlu0 %878 }
  0xd9   : > { %1216 = vperm.xlu0 %1513, %v2221_v0   ;;  %v928_v4 = vmul.f32 %v2302_v13, %v879_v20 }
  0xdc   : > { %1188 = vperm.xlu1 %1514, %v2129_v42  }
  0xdd   : > { %v2288_v18 = vpop.permute.xlu1 %893 }
  0xe0   : > { %1196 = vperm.xlu1 %1514, %v2176_v23   ;;  %v2297_v23 = vld [vmem:[%s2504_s4 + $0x1] ss:$0 sm:$0xff] }
  0xe4   : > { %1204 = vperm.xlu1 %1514, %v2212_v37   ;;  %v889_v49 = vpop.permute.xlu0 %888 }
  0xe5   : > { %v930_v2 = vmul.f32 %v2302_v13, %v889_v49  ;;  %v2361_v49 = vld [vmem:[%s2504_s4 + $0x2] ss:$0 sm:$0xff] }
  0xe8   : > { %1212 = vperm.xlu1 %1514, %v2228_v51   ;;  %v2290_v1 = vpop.permute.xlu1 %903 }
  0xed   : > { %v899_v19 = vpop.permute.xlu0 %898 }
  0xee   : > { %v932_v30 = vmul.f32 %v2302_v13, %v899_v19 }
  0xf1   : > { %v2292_v42 = vpop.permute.xlu1 %913 }
  0xf5   : > { %v909_v32 = vpop.permute.xlu0 %908 }
  0xf6   : > { %v934_v59 = vmul.f32 %v2302_v13, %v909_v32 }
  0xfa   : > { %v955_v8 = vpop.permute.xlu0 %954 }
  0xfb   : > { %v1021_v32 = vmul.f32 %v2297_v23, %v955_v8  ;;  %v923_v8 = vmul.f32 %v2302_v13, %v2272_v10  ;;  %v925_v10 = vmul.f32 %v2302_v13, %v2277_v35  ;;  %v927_v35 = vmul.f32 %v2302_v13, %v2281_v38 }
  0xfc   : > { %v849_v45 = vpop.permute.xlu1 %848 }
  0xfd   : > { %v922_v61 = vmul.f32 %v2302_v13, %v849_v45 }
  0xfe   : > { %v967_v7 = vpop.permute.xlu0 %966 }
 0x101   : > { %v959_v9 = vpop.permute.xlu1 %958 }
 0x102   : > { %v1022_v25 = vmul.f32 %v2297_v23, %v959_v9  ;;  %v975_v58 = vpop.permute.xlu0 %974  ;;  %v920_v9 = vmul.f32 %v2302_v13, %v2270_v29 }
 0x104   : > { %v2306_v41 = vadd.f32 %v1022_v25, %v921_v21 }
 0x105   : > { %v963_v28 = vpop.permute.xlu1 %962 }
 0x106   : > { %v1023_v3 = vmul.f32 %v2297_v23, %v963_v28  ;;  %v2310_v43 = vpop.permute.xlu0 %982  ;;  %v2372_v28 = vld [vmem:[%s2504_s4 + $0x3] ss:$0 sm:$0xff] }
 0x108   : > { %v2312_v14 = vadd.f32 %v1023_v3, %v922_v61  ;;  %v1037_v61 = vadd.f32 %v1021_v32, %v920_v9  ;;  %v1024_v3 = vmul.f32 %v2297_v23, %v967_v7  ;;  %v929_v9 = vmul.f32 %v2302_v13, %v2285_v5 }
 0x109   : > { %v971_v62 = vpop.permute.xlu1 %970  ;;  %v931_v5 = vmul.f32 %v2302_v13, %v2288_v18 }
 0x10a   : > { %v1025_v54 = vmul.f32 %v2297_v23, %v971_v62  ;;  %v2316_v31 = vpop.permute.xlu0 %990 }
 0x10b   : > { %v1030_v32 = vmul.f32 %v2297_v23, %v2316_v31 }
 0x10c   : > { %v2318_v15 = vadd.f32 %v1025_v54, %v924_v57 }
 0x10d   : > { %v979_v53 = vpop.permute.xlu1 %978 }
 0x10e   : > { %v1027_v37 = vmul.f32 %v2297_v23, %v979_v53  ;;  %v2322_v44 = vpop.permute.xlu0 %998 }
 0x110   : > { %v2324_v33 = vadd.f32 %v1027_v37, %v926_v26  ;;  %v1040_v26 = vadd.f32 %v1024_v3, %v923_v8  ;;  %v1026_v37 = vmul.f32 %v2297_v23, %v975_v58  ;;  %v1046_v8 = vadd.f32 %v1030_v32, %v929_v9 }
 0x111   : > { %v987_v39 = vpop.permute.xlu1 %986 }
 0x112   : > { %v1029_v22 = vmul.f32 %v2297_v23, %v987_v39  ;;  %v2328_v63 = vpop.permute.xlu0 %1006 }
 0x114   : > { %v2330_v60 = vadd.f32 %v1029_v22, %v928_v4 }
 0x115   : > { %v995_v27 = vpop.permute.xlu1 %994 }
 0x116   : > { %v1031_v50 = vmul.f32 %v2297_v23, %v995_v27  ;;  %v2334_v0 = vpop.permute.xlu0 %1014 }
 0x118   : > { %v2336_v12 = vadd.f32 %v1031_v50, %v930_v2  ;;  %v1042_v50 = vadd.f32 %v1026_v37, %v925_v10 }
 0x119   : > { %v1003_v40 = vpop.permute.xlu1 %1002 }
 0x11a   : > { %v1033_v6 = vmul.f32 %v2297_v23, %v1003_v40  ;;  %v1028_v40 = vmul.f32 %v2297_v23, %v2310_v43 }
 0x11b   : > { %v1060_v16 = vpop.permute.xlu0 %1059 }
 0x11c   : > { %v2340_v56 = vadd.f32 %v1033_v6, %v932_v30  ;;  %v1123_v38 = vmul.f32 %v2361_v49, %v1060_v16 }
 0x11d   : > { %v1011_v51 = vpop.permute.xlu1 %1010 }
 0x11e   : > { %v1035_v46 = vmul.f32 %v2297_v23, %v1011_v51  ;;  %v1139_v16 = vadd.f32 %v1123_v38, %v2306_v41  ;;  %v1034_v41 = vmul.f32 %v2297_v23, %v2328_v63 }
 0x11f   : > { %v2344_v11 = vpop.permute.xlu0 %1071 }
 0x120   : > { %v2346_v47 = vadd.f32 %v1035_v46, %v934_v59 }
 0x122   : > { %v1056_v24 = vpop.permute.xlu1 %1055 }
 0x123   : > { %v2348_v52 = vpop.permute.xlu0 %1079  ;;  %v1122_v21 = vmul.f32 %v2361_v49, %v1056_v24 }
 0x125   : > { %v1138_v57 = vadd.f32 %v1122_v21, %v1037_v61 }
 0x126   : > { %v2350_v17 = vpop.permute.xlu1 %1063 }
 0x127   : > { %v2352_v34 = vpop.permute.xlu0 %1087 }
 0x12a   : > { %v1068_v55 = vpop.permute.xlu1 %1067 }
 0x12b   : > { %v2354_v48 = vpop.permute.xlu0 %1095  ;;  %v1125_v54 = vmul.f32 %v2361_v49, %v1068_v55 }
 0x12d   : > { %v1141_v4 = vadd.f32 %v1125_v54, %v1040_v26 }
 0x12e   : > { %v1076_v36 = vpop.permute.xlu1 %1075 }
 0x12f   : > { %v2356_v20 = vpop.permute.xlu0 %1103  ;;  %v1127_v22 = vmul.f32 %v2361_v49, %v1076_v36  ;;  %v1044_v36 = vadd.f32 %v1028_v40, %v927_v35 }
 0x131   : > { %v1143_v51 = vadd.f32 %v1127_v22, %v1042_v50 }
 0x132   : > { %v1084_v19 = vpop.permute.xlu1 %1083 }
 0x133   : > { %v2364_v45 = vpop.permute.xlu0 %1111  ;;  %v1129_v59 = vmul.f32 %v2361_v49, %v1084_v19 }
 0x135   : > { %v1145_v61 = vadd.f32 %v1129_v59, %v1044_v36 }
 0x136   : > { %v1092_v25 = vpop.permute.xlu1 %1091 }
 0x137   : > { %v1131_v19 = vmul.f32 %v2361_v49, %v1092_v25  ;;  %v1124_v25 = vmul.f32 %v2361_v49, %v2350_v17 }
 0x138   : > { %v1157_v62 = vpop.permute.xlu0 %1156 }
 0x139   : > { %v1223_v29 = vmul.f32 %v2372_v28, %v1157_v62  ;;  %v1147_v37 = vadd.f32 %v1131_v19, %v1046_v8 }
 0x13a   : > { %v1100_v53 = vpop.permute.xlu1 %1099 }
 0x13b   : > { %v1239_v39 = vadd.f32 %v1223_v29, %v1138_v57  ;;  %v1032_v57 = vmul.f32 %v2297_v23, %v2322_v44 }
 0x13c   : > { %v1169_v7 = vpop.permute.xlu0 %1168 }
 0x13d   : > { %v1255_v27 = vmax.f32 %v1239_v39, 0.0  ;;  %v1226_v58 = vmul.f32 %v2372_v28, %v1169_v7  ;;  %v1133_v39 = vmul.f32 %v2361_v49, %v1100_v53  ;;  %v1048_v18 = vadd.f32 %v1032_v57, %v931_v5 }
 0x13e   : > { %v1108_v2 = vpop.permute.xlu1 %1107  ;;  %v1126_v53 = vmul.f32 %v2361_v49, %v2344_v11  ;;  %v1132_v5 = vmul.f32 %v2361_v49, %v2354_v48 }
 0x13f   : > { %1272 = vst.msk [vmem:[%s2385_s12] sm:$0xff] %vm1271_vm4, %v1255_v27  ;;  %v1242_v30 = vadd.f32 %v1226_v58, %v1141_v4  ;;  %v933_v4 = vmul.f32 %v2302_v13, %v2290_v1  ;;  %v1140_v27 = vadd.f32 %v1124_v25, %v2312_v14  ;;  %v1135_v1 = vmul.f32 %v2361_v49, %v1108_v2 }
 0x140   : > { %v1177_v6 = vpop.permute.xlu0 %1176  ;;  %v1036_v14 = vmul.f32 %v2297_v23, %v2334_v0  ;;  %v1142_v2 = vadd.f32 %v1126_v53, %v2318_v15 }
 0x141   : > { %v1258_v46 = vmax.f32 %v1242_v30, 0.0  ;;  %v1228_v24 = vmul.f32 %v2372_v28, %v1177_v6  ;;  %v1149_v30 = vadd.f32 %v1133_v39, %v1048_v18  ;;  %v1050_v11 = vadd.f32 %v1034_v41, %v933_v4 }
 0x142   : > { %v1116_v55 = vpop.permute.xlu1 %1115  ;;  %v1148_v39 = vadd.f32 %v1132_v5, %v2336_v12  ;;  %v1136_v18 = vmul.f32 %v2361_v49, %v2364_v45 }
 0x143   : > { %1275 = vst.msk [vmem:[%s2385_s12 + $0x18] sm:$0xff] %vm1271_vm4, %v1258_v46  ;;  %v1244_v43 = vadd.f32 %v1228_v24, %v1143_v51  ;;  %v935_v51 = vmul.f32 %v2302_v13, %v2292_v42  ;;  %v1128_v24 = vmul.f32 %v2361_v49, %v2348_v52  ;;  %v1151_v9 = vadd.f32 %v1135_v1, %v1050_v11 }
 0x144   : > { %v1185_v21 = vpop.permute.xlu0 %1184  ;;  %v1137_v42 = vmul.f32 %v2361_v49, %v1116_v55 }
 0x145   : > { %v1260_v3 = vmax.f32 %v1244_v43, 0.0  ;;  %v1230_v62 = vmul.f32 %v2372_v28, %v1185_v21  ;;  %v1052_v38 = vadd.f32 %v1036_v14, %v935_v51  ;;  %v1144_v21 = vadd.f32 %v1128_v24, %v2324_v33 }
 0x147   : > { %1277 = vst.msk [vmem:[%s2385_s12 + $0x28] sm:$0xff] %vm1271_vm4, %v1260_v3  ;;  %v1161_v31 = vpop.permute.xlu1 %1160  ;;  %v1246_v54 = vadd.f32 %v1230_v62, %v1145_v61  ;;  %v1130_v61 = vmul.f32 %v2361_v49, %v2352_v34  ;;  %v1153_v62 = vadd.f32 %v1137_v42, %v1052_v38 }
 0x148   : > { %v1224_v29 = vmul.f32 %v2372_v28, %v1161_v31  ;;  %v1193_v26 = vpop.permute.xlu0 %1192 }
 0x149   : > { %v1262_v44 = vmax.f32 %v1246_v54, 0.0  ;;  %v1232_v10 = vmul.f32 %v2372_v28, %v1193_v26  ;;  %v1146_v34 = vadd.f32 %v1130_v61, %v2330_v60 }
 0x14a   : > { %v1240_v7 = vadd.f32 %v1224_v29, %v1139_v16 }
 0x14b   : > { %1279 = vst.msk [vmem:[%s2385_s12 + $0x38] sm:$0xff] %vm1271_vm4, %v1262_v44  ;;  %v1165_v17 = vpop.permute.xlu1 %1164  ;;  %v1248_v22 = vadd.f32 %v1232_v10, %v1147_v37  ;;  %v1134_v44 = vmul.f32 %v2361_v49, %v2356_v20 }
 0x14c   : > { %v1256_v58 = vmax.f32 %v1240_v7, 0.0  ;;  %v1225_v50 = vmul.f32 %v2372_v28, %v1165_v17  ;;  %v1201_v40 = vpop.permute.xlu0 %1200 }
 0x14d   : > { %v1264_v35 = vmax.f32 %v1248_v22, 0.0  ;;  %v1234_v63 = vmul.f32 %v2372_v28, %v1201_v40  ;;  %v1150_v4 = vadd.f32 %v1134_v44, %v2340_v56  ;;  %v1152_v22 = vadd.f32 %v1136_v18, %v2346_v47 }
 0x14e   : > { %1273 = vst.msk [vmem:[%s2385_s12 + $0x8] sm:$0xff] %vm1271_vm4, %v1256_v58  ;;  %v1241_v6 = vadd.f32 %v1225_v50, %v1140_v27 }
 0x14f   : > { %1281 = vst.msk [vmem:[%s2385_s12 + $0x48] sm:$0xff] %vm1271_vm4, %v1264_v35  ;;  %v1173_v59 = vpop.permute.xlu1 %1172  ;;  %v1250_v46 = vadd.f32 %v1234_v63, %v1149_v30 }
 0x150   : > { %v1257_v36 = vmax.f32 %v1241_v6, 0.0  ;;  %v1227_v32 = vmul.f32 %v2372_v28, %v1173_v59  ;;  %v1209_v43 = vpop.permute.xlu0 %1208 }
 0x151   : > { %v1266_v13 = vmax.f32 %v1250_v46, 0.0  ;;  %v1236_v23 = vmul.f32 %v2372_v28, %v1209_v43 }
 0x152   : > { %1274 = vst.msk [vmem:[%s2385_s12 + $0x10] sm:$0xff] %vm1271_vm4, %v1257_v36  ;;  %v1243_v0 = vadd.f32 %v1227_v32, %v1142_v2 }
 0x153   : > { %1283 = vst.msk [vmem:[%s2385_s12 + $0x58] sm:$0xff] %vm1271_vm4, %v1266_v13  ;;  %v1181_v15 = vpop.permute.xlu1 %1180  ;;  %v1252_v52 = vadd.f32 %v1236_v23, %v1151_v9 }
 0x154   : > { %v1259_v19 = vmax.f32 %v1243_v0, 0.0  ;;  %v1229_v55 = vmul.f32 %v2372_v28, %v1181_v15  ;;  %v1217_v3 = vpop.permute.xlu0 %1216 }
 0x155   : > { %v1268_v8 = vmax.f32 %v1252_v52, 0.0  ;;  %v1238_v57 = vmul.f32 %v2372_v28, %v1217_v3 }
 0x156   : > { %1276 = vst.msk [vmem:[%s2385_s12 + $0x20] sm:$0xff] %vm1271_vm4, %v1259_v19  ;;  %v1245_v31 = vadd.f32 %v1229_v55, %v1144_v21 }
 0x157   : > { %1285 = vst.msk [vmem:[%s2385_s12 + $0x68] sm:$0xff] %vm1271_vm4, %v1268_v8  ;;  %v1189_v33 = vpop.permute.xlu1 %1188  ;;  %v1254_v54 = vadd.f32 %v1238_v57, %v1153_v62 }
 0x158   : > { %v1261_v16 = vmax.f32 %v1245_v31, 0.0  ;;  %v1231_v25 = vmul.f32 %v2372_v28, %v1189_v33 }
 0x159   : > { %v1270_v29 = vmax.f32 %v1254_v54, 0.0 }
 0x15a   : > { %1278 = vst.msk [vmem:[%s2385_s12 + $0x30] sm:$0xff] %vm1271_vm4, %v1261_v16  ;;  %v1247_v26 = vadd.f32 %v1231_v25, %v1146_v34 }
 0x15b   : > { %1287 = vst.msk [vmem:[%s2385_s12 + $0x78] sm:$0xff] %vm1271_vm4, %v1270_v29  ;;  %v1197_v37 = vpop.permute.xlu1 %1196 }
 0x15c   : > { %v1263_v60 = vmax.f32 %v1247_v26, 0.0  ;;  %v1233_v48 = vmul.f32 %v2372_v28, %v1197_v37 }
 0x15e   : > { %1280 = vst.msk [vmem:[%s2385_s12 + $0x40] sm:$0xff] %vm1271_vm4, %v1263_v60  ;;  %v1249_v10 = vadd.f32 %v1233_v48, %v1148_v39 }
 0x15f   : > { %v1205_v7 = vpop.permute.xlu1 %1204 }
 0x160   : > { %v1265_v41 = vmax.f32 %v1249_v10, 0.0  ;;  %v1235_v12 = vmul.f32 %v2372_v28, %v1205_v7 }
 0x162   : > { %1282 = vst.msk [vmem:[%s2385_s12 + $0x50] sm:$0xff] %vm1271_vm4, %v1265_v41  ;;  %v1251_v20 = vadd.f32 %v1235_v12, %v1150_v4 }
 0x163   : > { %v1213_v17 = vpop.permute.xlu1 %1212 }
 0x164   : > { %v1267_v53 = vmax.f32 %v1251_v20, 0.0  ;;  %v1237_v27 = vmul.f32 %v2372_v28, %v1213_v17 }
 0x166   : > { %1284 = vst.msk [vmem:[%s2385_s12 + $0x60] sm:$0xff] %vm1271_vm4, %v1267_v53  ;;  %v1253_v58 = vadd.f32 %v1237_v27, %v1152_v22 }
 0x168   : > { %v1269_v50 = vmax.f32 %v1253_v58, 0.0 }
 0x16a   : > { %1286 = vst.msk [vmem:[%s2385_s12 + $0x70] sm:$0xff] %vm1271_vm4, %v1269_v50 }
 0x16b PF: > { %s15_s22 = sadd.s32 1, %s1553_s22   ;;  %s2506_s18 = smov %s1545_s20 }
 0x16c   : > { %p12_p8 = scmp.ge.s32.totalorder %s15_s22, 6   ;;  %s2507_s19 = smov %s1549_s21 }
 0x16d   : > { %s2508_s20 = smov %s2511_s23  ;;  %s2509_s21 = smov %s2515_s24 }
 0x16e   :  { %14 = sbr.rel (!%p12_p8) target bundleno = 3 (0x3), region = 76 }

</bundles_post_ra>
